<compile_context>
chip_gen: v5e
topology: v5e:2x2
jax: 0.10.0
libtpu: 0.0.40
codegen_flags: <defaults>
</compile_context>

<pallas_src>
import jax
import jax.numpy as jnp
from jax.experimental import pallas as pl
from jax.experimental.pallas import tpu as pltpu

KEY_FEATURES = ("Tmp", "Srad", "P/PET", "NPP")
KEY_WEIGHTS = {"Tmp": 0.1161, "Srad": 0.3214, "P/PET": 0.3661, "NPP": 0.1964}

_LANES = 128
_SUBLANES = 8
_CHUNK = 128            # rows folded per inner-loop step (multiple of 32)


def _cdiv(a, b):
    return -(-a // b)


def _round_down(a, b):
    return (a // b) * b


def _make_wt_sq_kernel(tile_rows, chunk, tiles_per_split):
    """Streaming sum((yp - yt)^2) partial-sum kernel for one (tile_rows,128) tile."""
    n_chunks = tile_rows // chunk
    assert n_chunks * chunk == tile_rows

    def kernel(rows_ref, yp_ref, yt_ref, out_ref):
        c = pl.program_id(0)          # split ("parallel") axis
        j = pl.program_id(1)          # reduction ("arbitrary") axis

        @pl.when(j == 0)
        def _init():
            out_ref[...] = jnp.zeros_like(out_ref)

        rows_valid = rows_ref[0]
        row0 = (c * tiles_per_split + j) * tile_rows    # logical first row of this tile

        def chunk_body(i, acc):
            off = pl.multiple_of(i * chunk, chunk)
            yp = yp_ref[pl.ds(off, chunk), :].astype(jnp.float32)
            yt = yt_ref[pl.ds(off, chunk), :].astype(jnp.float32)
            d = yp - yt
            r = d * d
            # Mask rows past the end of the data (ragged last tile / overhang
            # blocks read unspecified VMEM, which must contribute exactly 0).
            gid = row0 + off + jax.lax.broadcasted_iota(jnp.int32, (chunk, _LANES), 0)
            r = jnp.where(gid < rows_valid, r, 0.0)
            # Fold (chunk,128) -> (8,128): 8-row-aligned slices, plain VPU adds.
            folded = r[0:_SUBLANES, :]
            for k in range(1, chunk // _SUBLANES):
                folded = folded + r[k * _SUBLANES:(k + 1) * _SUBLANES, :]
            return acc + folded

        acc0 = jnp.zeros((_SUBLANES, _LANES), jnp.float32)
        acc = jax.lax.fori_loop(0, n_chunks, chunk_body, acc0, unroll=True)
        out_ref[...] = out_ref[...] + acc

    return kernel


def _scalar_scale(all_features, feature_importance):
    """Scalar factor from the dict/key-weight logic (resolved at trace time,
    exactly like the Python control flow in the torch module)."""
    key_term = jnp.float32(0.0)
    for f in KEY_FEATURES:
        if f in feature_importance:
            imp = jnp.asarray(feature_importance[f], dtype=jnp.float32)
            if imp.size != 1:
                # TODO(synk): per-element importance arrays would need an
                # elementwise-weighted kernel path; only scalars are supported.
                raise ValueError("feature_importance values must be scalars")
            key_term = key_term + jnp.float32(KEY_WEIGHTS[f]) * imp.reshape(())
    total_w = float(sum(KEY_WEIGHTS.values()))
    has_other = 1.0 if any(f not in KEY_FEATURES for f in all_features.keys()) else 0.0
    return key_term / jnp.float32(total_w) + jnp.float32(has_other)


def tab_transformer_wt_loss(y_pred, y_true, all_features, feature_importance, *,
                            tile_rows=2048, num_splits=1, input_buffers=2,
                            small_n_threshold=1 << 20, force_pallas=False):
    """Pallas implementation of TabTransformerWTLoss.forward (returns scalar loss).

    num_splits   : 1 on v5e/v6e (single TensorCore); set 2 on v7x (megacore).
    input_buffers: >2 requests deeper input pipelining (pl.Buffered) — v7x micro-opt.
    """
    y_pred = jnp.asarray(y_pred)
    y_true = jnp.asarray(y_true)
    if y_pred.shape != y_true.shape:
        raise ValueError("y_pred and y_true must have the same shape")
    n = int(y_pred.size)
    scale = _scalar_scale(all_features, feature_importance)
    scale_factor = scale * jnp.float32(0.5 / max(n, 1))   # mean((...)/2) folded in

    rows = n // _LANES                       # full lane-dense rows
    rem = n - rows * _LANES                  # <128-element ragged remainder
    sub_mult = 32 // min(y_pred.dtype.itemsize, y_true.dtype.itemsize, 4)

    use_pallas = force_pallas or n >= small_n_threshold
    if rows < sub_mult:                      # too small to form a single legal tile
        use_pallas = False

    if not use_pallas:
        d = y_pred.astype(jnp.float32) - y_true.astype(jnp.float32)
        return jnp.sum(d * d) * scale_factor

    # ---- lane-dense view of the bulk (free reshape when n % 128 == 0) -------
    yp_flat = y_pred.reshape(-1)
    yt_flat = y_true.reshape(-1)
    if rem == 0:
        yp_main = yp_flat.reshape(rows, _LANES)
        yt_main = yt_flat.reshape(rows, _LANES)
        tail_sq = jnp.float32(0.0)
    else:
        # Only the (rare) non-multiple-of-128 case pays for the bulk slice; the
        # <128-element remainder is summed in plain JAX.
        cut = rows * _LANES
        yp_main = yp_flat[:cut].reshape(rows, _LANES)
        yt_main = yt_flat[:cut].reshape(rows, _LANES)
        dt = yp_flat[cut:].astype(jnp.float32) - yt_flat[cut:].astype(jnp.float32)
        tail_sq = jnp.sum(dt * dt)

    # ---- tiling --------------------------------------------------------------
    if rows >= _CHUNK:
        tile_rows_eff = min(max(_round_down(int(tile_rows), _CHUNK), _CHUNK),
                            _round_down(rows, _CHUNK))
        chunk = _CHUNK
    else:
        tile_rows_eff = _round_down(rows, sub_mult)
        chunk = tile_rows_eff

    tiles_total = _cdiv(rows, tile_rows_eff)
    num_splits_eff = max(1, min(int(num_splits), tiles_total))
    tiles_per_split = _cdiv(tiles_total, num_splits_eff)

    if num_splits_eff * tiles_per_split > tiles_total:
        last = tiles_total - 1
        def in_map(c, j, rows_ref):          # clamp overhang blocks (masked to 0 in-kernel)
            return (jnp.minimum(c * tiles_per_split + j, last), 0)
    else:
        def in_map(c, j, rows_ref):
            return (c * tiles_per_split + j, 0)

    spec_kwargs = {}
    if input_buffers and int(input_buffers) > 2:
        spec_kwargs["pipeline_mode"] = pl.Buffered(int(input_buffers))
    in_spec = pl.BlockSpec((tile_rows_eff, _LANES), in_map, **spec_kwargs)

    kernel = _make_wt_sq_kernel(tile_rows_eff, chunk, tiles_per_split)
    rows_arr = jnp.array([rows], dtype=jnp.int32)

    partials = pl.pallas_call(
        kernel,
        out_shape=jax.ShapeDtypeStruct((num_splits_eff * _SUBLANES, _LANES), jnp.float32),
        grid_spec=pltpu.PrefetchScalarGridSpec(
            num_scalar_prefetch=1,
            grid=(num_splits_eff, tiles_per_split),
            in_specs=[in_spec, in_spec],
            out_specs=pl.BlockSpec((_SUBLANES, _LANES), lambda c, j, rows_ref: (c, 0)),
        ),
        compiler_params=pltpu.CompilerParams(
            dimension_semantics=("parallel", "arbitrary"),
            vmem_limit_bytes=32 * 1024 * 1024,
        ),
    )(rows_arr, yp_main, yt_main)

    # Tiny (num_splits*8, 128) final reduction + scalar scale in the wrapper.
    return (jnp.sum(partials) + tail_sq) * scale_factor


def reference_loss(y_pred, y_true, all_features, feature_importance):
    """Pure-JAX transcription of the PyTorch forward (for verification)."""
    y_pred = jnp.asarray(y_pred, jnp.float32)
    y_true = jnp.asarray(y_true, jnp.float32)
    base_mse = (y_pred - y_true) ** 2
    weighted = jnp.zeros_like(base_mse)
    for f in KEY_FEATURES:
        if f in feature_importance:
            weighted = weighted + KEY_WEIGHTS[f] * feature_importance[f] * base_mse
    weighted = weighted / sum(KEY_WEIGHTS.values())
    if any(f not in KEY_FEATURES for f in all_features.keys()):
        other = base_mse
    else:
        other = jnp.zeros_like(base_mse)
    return jnp.mean((weighted + other) / 2.0)


if __name__ == "__main__":
    key = jax.random.PRNGKey(0)
    k1, k2, k3 = jax.random.split(key, 3)

    # 300 full lane-rows + a ragged 37-element tail: exercises the multi-tile
    # grid, the in-kernel row masking of the last tile, and the JAX remainder.
    batch = 300 * 128 + 37

    y_pred = jax.random.normal(k1, (batch, 1), dtype=jnp.float32)
    y_true = jax.random.normal(k2, (batch, 1), dtype=jnp.float32)

    feat_names = ["Tmp", "Srad", "P/PET", "NPP", "Clay", "Sand"]
    feat_vals = jax.random.normal(k3, (len(feat_names), batch), dtype=jnp.float32)
    all_features = {name: feat_vals[i] for i, name in enumerate(feat_names)}
    feature_importance = {
        "Tmp": 0.25, "Srad": 0.20, "P/PET": 0.30,
        "NPP": 0.15, "Clay": 0.05, "Sand": 0.05,
    }

    ref = reference_loss(y_pred, y_true, all_features, feature_importance)

    # Single-TensorCore config (v5e / v6e default).
    loss1 = jax.block_until_ready(
        tab_transformer_wt_loss(y_pred, y_true, all_features, feature_importance,
                                force_pallas=True))
    assert jnp.allclose(loss1, ref, rtol=1e-5, atol=1e-6), (loss1, ref)

    # 2-way megacore split (v7x config) — also runs correctly on 1-TC chips.
    loss2 = jax.block_until_ready(
        tab_transformer_wt_loss(y_pred, y_true, all_features, feature_importance,
                                num_splits=2, force_pallas=True))
    assert jnp.allclose(loss2, ref, rtol=1e-5, atol=1e-6), (loss2, ref)

    print("KERNEL_OK")
</pallas_src>

<mosaic_0001>
module attributes {stable_mosaic.version = 11 : i64} {
  func.func @kernel(%arg0: i32, %arg1: i32, %arg2: memref<1xi32, #tpu.memory_space<smem>>, %arg3: memref<256x128xf32, #tpu.memory_space<vmem>>, %arg4: memref<256x128xf32, #tpu.memory_space<vmem>>, %arg5: memref<8x128xf32, #tpu.memory_space<vmem>>) attributes {dimension_semantics = [#tpu.dimension_semantics<parallel>, #tpu.dimension_semantics<arbitrary>], iteration_bounds = array<i64: 1, 2>, scalar_prefetch = 1 : i64, scratch_operands = 0 : i64, tpu.core_type = #tpu.core_type<tc>, window_params = [{transform_indices = @transform_0, window_bounds = array<i64: 256, 128>}, {transform_indices = @transform_1, window_bounds = array<i64: 256, 128>}, {transform_indices = @transform_2, window_bounds = array<i64: 8, 128>}]} {
    %c0_i32 = arith.constant 0 : i32
    %0 = arith.cmpi eq, %arg1, %c0_i32 : i32
    %1 = arith.extui %0 : i1 to i32
    %c0_i32_0 = arith.constant 0 : i32
    %2 = arith.cmpi ne, %1, %c0_i32_0 : i32
    scf.if %2 {
      %cst_14 = arith.constant 0.000000e+00 : f32
      %107 = vector.broadcast %cst_14 : f32 to vector<8x128xf32>
      %c0_15 = arith.constant 0 : index
      %c0_16 = arith.constant 0 : index
      %108 = vector.load %arg5[%c0_15, %c0_16] : memref<8x128xf32, #tpu.memory_space<vmem>>, vector<8x128xf32>
      tpu.vector_store %arg5[%c0_15, %c0_16], %107 {strides = array<i32>} : memref<8x128xf32, #tpu.memory_space<vmem>>, vector<8x128xf32>,
    } else {
    }
    %c0 = arith.constant 0 : index
    %3 = memref.load %arg2[%c0] : memref<1xi32, #tpu.memory_space<smem>>
    %c2_i32 = arith.constant 2 : i32
    %4 = arith.muli %arg0, %c2_i32 : i32
    %5 = arith.addi %4, %arg1 : i32
    %c256_i32 = arith.constant 256 : i32
    %6 = arith.muli %5, %c256_i32 : i32
    %cst = arith.constant 0.000000e+00 : f32
    %7 = vector.broadcast %cst : f32 to vector<8x128xf32>
    %c0_i32_1 = arith.constant 0 : i32
    %c128_i32 = arith.constant 128 : i32
    %8 = arith.muli %c0_i32_1, %c128_i32 : i32
    %9 = tpu.assume_multiple %8, 128 : i32
    %10 = arith.index_cast %9 : i32 to index
    %c0_2 = arith.constant 0 : index
    %11 = vector.load %arg3[%10, %c0_2] : memref<256x128xf32, #tpu.memory_space<vmem>>, vector<128x128xf32>
    %12 = arith.index_cast %9 : i32 to index
    %c0_3 = arith.constant 0 : index
    %13 = vector.load %arg4[%12, %c0_3] : memref<256x128xf32, #tpu.memory_space<vmem>>, vector<128x128xf32>
    %14 = arith.subf %11, %13 : vector<128x128xf32>
    %15 = arith.mulf %14, %14 : vector<128x128xf32>
    %16 = arith.addi %6, %9 : i32
    %17 = tpu.iota {dimensions = array<i32: 0>} : vector<128x128xi32>
    %18 = vector.broadcast %16 : i32 to vector<128x128xi32>
    %19 = arith.addi %18, %17 : vector<128x128xi32>
    %20 = vector.broadcast %3 : i32 to vector<128x128xi32>
    %21 = arith.cmpi slt, %19, %20 : vector<128x128xi32>
    %cst_4 = arith.constant 0.000000e+00 : f32
    %22 = vector.broadcast %cst_4 : f32 to vector<128x128xf32>
    %23 = arith.select %21, %15, %22 : vector<128x128xi1>, vector<128x128xf32>
    %24 = vector.extract_strided_slice %23 {offsets = [0, 0], sizes = [8, 128], strides = [1, 1]} : vector<128x128xf32> to vector<8x128xf32>
    %25 = vector.extract_strided_slice %23 {offsets = [8, 0], sizes = [8, 128], strides = [1, 1]} : vector<128x128xf32> to vector<8x128xf32>
    %26 = arith.addf %24, %25 : vector<8x128xf32>
    %27 = vector.extract_strided_slice %23 {offsets = [16, 0], sizes = [8, 128], strides = [1, 1]} : vector<128x128xf32> to vector<8x128xf32>
    %28 = arith.addf %26, %27 : vector<8x128xf32>
    %29 = vector.extract_strided_slice %23 {offsets = [24, 0], sizes = [8, 128], strides = [1, 1]} : vector<128x128xf32> to vector<8x128xf32>
    %30 = arith.addf %28, %29 : vector<8x128xf32>
    %31 = vector.extract_strided_slice %23 {offsets = [32, 0], sizes = [8, 128], strides = [1, 1]} : vector<128x128xf32> to vector<8x128xf32>
    %32 = arith.addf %30, %31 : vector<8x128xf32>
    %33 = vector.extract_strided_slice %23 {offsets = [40, 0], sizes = [8, 128], strides = [1, 1]} : vector<128x128xf32> to vector<8x128xf32>
    %34 = arith.addf %32, %33 : vector<8x128xf32>
    %35 = vector.extract_strided_slice %23 {offsets = [48, 0], sizes = [8, 128], strides = [1, 1]} : vector<128x128xf32> to vector<8x128xf32>
    %36 = arith.addf %34, %35 : vector<8x128xf32>
    %37 = vector.extract_strided_slice %23 {offsets = [56, 0], sizes = [8, 128], strides = [1, 1]} : vector<128x128xf32> to vector<8x128xf32>
    %38 = arith.addf %36, %37 : vector<8x128xf32>
    %39 = vector.extract_strided_slice %23 {offsets = [64, 0], sizes = [8, 128], strides = [1, 1]} : vector<128x128xf32> to vector<8x128xf32>
    %40 = arith.addf %38, %39 : vector<8x128xf32>
    %41 = vector.extract_strided_slice %23 {offsets = [72, 0], sizes = [8, 128], strides = [1, 1]} : vector<128x128xf32> to vector<8x128xf32>
    %42 = arith.addf %40, %41 : vector<8x128xf32>
    %43 = vector.extract_strided_slice %23 {offsets = [80, 0], sizes = [8, 128], strides = [1, 1]} : vector<128x128xf32> to vector<8x128xf32>
    %44 = arith.addf %42, %43 : vector<8x128xf32>
    %45 = vector.extract_strided_slice %23 {offsets = [88, 0], sizes = [8, 128], strides = [1, 1]} : vector<128x128xf32> to vector<8x128xf32>
    %46 = arith.addf %44, %45 : vector<8x128xf32>
    %47 = vector.extract_strided_slice %23 {offsets = [96, 0], sizes = [8, 128], strides = [1, 1]} : vector<128x128xf32> to vector<8x128xf32>
    %48 = arith.addf %46, %47 : vector<8x128xf32>
    %49 = vector.extract_strided_slice %23 {offsets = [104, 0], sizes = [8, 128], strides = [1, 1]} : vector<128x128xf32> to vector<8x128xf32>
    %50 = arith.addf %48, %49 : vector<8x128xf32>
    %51 = vector.extract_strided_slice %23 {offsets = [112, 0], sizes = [8, 128], strides = [1, 1]} : vector<128x128xf32> to vector<8x128xf32>
    %52 = arith.addf %50, %51 : vector<8x128xf32>
    %53 = vector.extract_strided_slice %23 {offsets = [120, 0], sizes = [8, 128], strides = [1, 1]} : vector<128x128xf32> to vector<8x128xf32>
    %54 = arith.addf %52, %53 : vector<8x128xf32>
    %55 = arith.addf %7, %54 : vector<8x128xf32>
    %c1_i32 = arith.constant 1 : i32
    %c128_i32_5 = arith.constant 128 : i32
    %56 = arith.muli %c1_i32, %c128_i32_5 : i32
    %57 = tpu.assume_multiple %56, 128 : i32
    %58 = arith.index_cast %57 : i32 to index
    %c0_6 = arith.constant 0 : index
    %59 = vector.load %arg3[%58, %c0_6] : memref<256x128xf32, #tpu.memory_space<vmem>>, vector<128x128xf32>
    %60 = arith.index_cast %57 : i32 to index
    %c0_7 = arith.constant 0 : index
    %61 = vector.load %arg4[%60, %c0_7] : memref<256x128xf32, #tpu.memory_space<vmem>>, vector<128x128xf32>
    %62 = arith.subf %59, %61 : vector<128x128xf32>
    %63 = arith.mulf %62, %62 : vector<128x128xf32>
    %64 = arith.addi %6, %57 : i32
    %65 = tpu.iota {dimensions = array<i32: 0>} : vector<128x128xi32>
    %66 = vector.broadcast %64 : i32 to vector<128x128xi32>
    %67 = arith.addi %66, %65 : vector<128x128xi32>
    %68 = vector.broadcast %3 : i32 to vector<128x128xi32>
    %69 = arith.cmpi slt, %67, %68 : vector<128x128xi32>
    %cst_8 = arith.constant 0.000000e+00 : f32
    %70 = vector.broadcast %cst_8 : f32 to vector<128x128xf32>
    %71 = arith.select %69, %63, %70 : vector<128x128xi1>, vector<128x128xf32>
    %72 = vector.extract_strided_slice %71 {offsets = [0, 0], sizes = [8, 128], strides = [1, 1]} : vector<128x128xf32> to vector<8x128xf32>
    %73 = vector.extract_strided_slice %71 {offsets = [8, 0], sizes = [8, 128], strides = [1, 1]} : vector<128x128xf32> to vector<8x128xf32>
    %74 = arith.addf %72, %73 : vector<8x128xf32>
    %75 = vector.extract_strided_slice %71 {offsets = [16, 0], sizes = [8, 128], strides = [1, 1]} : vector<128x128xf32> to vector<8x128xf32>
    %76 = arith.addf %74, %75 : vector<8x128xf32>
    %77 = vector.extract_strided_slice %71 {offsets = [24, 0], sizes = [8, 128], strides = [1, 1]} : vector<128x128xf32> to vector<8x128xf32>
    %78 = arith.addf %76, %77 : vector<8x128xf32>
    %79 = vector.extract_strided_slice %71 {offsets = [32, 0], sizes = [8, 128], strides = [1, 1]} : vector<128x128xf32> to vector<8x128xf32>
    %80 = arith.addf %78, %79 : vector<8x128xf32>
    %81 = vector.extract_strided_slice %71 {offsets = [40, 0], sizes = [8, 128], strides = [1, 1]} : vector<128x128xf32> to vector<8x128xf32>
    %82 = arith.addf %80, %81 : vector<8x128xf32>
    %83 = vector.extract_strided_slice %71 {offsets = [48, 0], sizes = [8, 128], strides = [1, 1]} : vector<128x128xf32> to vector<8x128xf32>
    %84 = arith.addf %82, %83 : vector<8x128xf32>
    %85 = vector.extract_strided_slice %71 {offsets = [56, 0], sizes = [8, 128], strides = [1, 1]} : vector<128x128xf32> to vector<8x128xf32>
    %86 = arith.addf %84, %85 : vector<8x128xf32>
    %87 = vector.extract_strided_slice %71 {offsets = [64, 0], sizes = [8, 128], strides = [1, 1]} : vector<128x128xf32> to vector<8x128xf32>
    %88 = arith.addf %86, %87 : vector<8x128xf32>
    %89 = vector.extract_strided_slice %71 {offsets = [72, 0], sizes = [8, 128], strides = [1, 1]} : vector<128x128xf32> to vector<8x128xf32>
    %90 = arith.addf %88, %89 : vector<8x128xf32>
    %91 = vector.extract_strided_slice %71 {offsets = [80, 0], sizes = [8, 128], strides = [1, 1]} : vector<128x128xf32> to vector<8x128xf32>
    %92 = arith.addf %90, %91 : vector<8x128xf32>
    %93 = vector.extract_strided_slice %71 {offsets = [88, 0], sizes = [8, 128], strides = [1, 1]} : vector<128x128xf32> to vector<8x128xf32>
    %94 = arith.addf %92, %93 : vector<8x128xf32>
    %95 = vector.extract_strided_slice %71 {offsets = [96, 0], sizes = [8, 128], strides = [1, 1]} : vector<128x128xf32> to vector<8x128xf32>
    %96 = arith.addf %94, %95 : vector<8x128xf32>
    %97 = vector.extract_strided_slice %71 {offsets = [104, 0], sizes = [8, 128], strides = [1, 1]} : vector<128x128xf32> to vector<8x128xf32>
    %98 = arith.addf %96, %97 : vector<8x128xf32>
    %99 = vector.extract_strided_slice %71 {offsets = [112, 0], sizes = [8, 128], strides = [1, 1]} : vector<128x128xf32> to vector<8x128xf32>
    %100 = arith.addf %98, %99 : vector<8x128xf32>
    %101 = vector.extract_strided_slice %71 {offsets = [120, 0], sizes = [8, 128], strides = [1, 1]} : vector<128x128xf32> to vector<8x128xf32>
    %102 = arith.addf %100, %101 : vector<8x128xf32>
    %103 = arith.addf %55, %102 : vector<8x128xf32>
    %c2_i32_9 = arith.constant 2 : i32
    %c0_10 = arith.constant 0 : index
    %c0_11 = arith.constant 0 : index
    %104 = vector.load %arg5[%c0_10, %c0_11] : memref<8x128xf32, #tpu.memory_space<vmem>>, vector<8x128xf32>
    %105 = arith.addf %104, %103 : vector<8x128xf32>
    %c0_12 = arith.constant 0 : index
    %c0_13 = arith.constant 0 : index
    %106 = vector.load %arg5[%c0_12, %c0_13] : memref<8x128xf32, #tpu.memory_space<vmem>>, vector<8x128xf32>
    tpu.vector_store %arg5[%c0_12, %c0_13], %105 {strides = array<i32>} : memref<8x128xf32, #tpu.memory_space<vmem>>, vector<8x128xf32>,
    return
  }
  func.func @transform_0(%arg0: i32, %arg1: i32, %arg2: memref<1xi32, #tpu.memory_space<smem>>) -> (i32, i32) {
    %c2_i32 = arith.constant 2 : i32
    %0 = arith.muli %arg0, %c2_i32 : i32
    %1 = arith.addi %0, %arg1 : i32
    %c0_i32 = arith.constant 0 : i32
    %c0_i32_0 = arith.constant 0 : i32
    return %1, %c0_i32 : i32, i32
  }
  func.func @transform_1(%arg0: i32, %arg1: i32, %arg2: memref<1xi32, #tpu.memory_space<smem>>) -> (i32, i32) {
    %c2_i32 = arith.constant 2 : i32
    %0 = arith.muli %arg0, %c2_i32 : i32
    %1 = arith.addi %0, %arg1 : i32
    %c0_i32 = arith.constant 0 : i32
    %c0_i32_0 = arith.constant 0 : i32
    return %1, %c0_i32 : i32, i32
  }
  func.func @transform_2(%arg0: i32, %arg1: i32, %arg2: memref<1xi32, #tpu.memory_space<smem>>) -> (i32, i32) {
    %c0_i32 = arith.constant 0 : i32
    %c0_i32_0 = arith.constant 0 : i32
    return %arg0, %c0_i32 : i32, i32
  }
}

</mosaic_0001>

<bundles_post_ra>
// kernel: tpu_custom_call.1
= control target key start
LH: loop header
LB: loop body
LE: loop exit
PB: predicated region body
PF: predicated region fallthrough
CT: control target
= control target key end

     0   :  { %s1396_s0 = inlined_call_operand.<no memory space> [shape: s32[1], index: 0, kind: input, shape index: {}]   ;;  %s1397_s1 = inlined_call_operand.hbm [shape: f32[300,128], index: 1, kind: input, shape index: {}]   ;;  %s1398_s2 = inlined_call_operand.hbm [shape: f32[300,128], index: 2, kind: input, shape index: {}]   ;;  %s1399_s3 = inlined_call_operand.hbm [shape: f32[8,128], index: 3, kind: output, shape index: {}]  }
   0x1   :  { %8 = sst [smem:[#allocation3]] %s1396_s0 }
   0x2   :  { %9 = vsyncpa [#allocation5], 0 }
   0x3   :  { %11 = vsyncpa [#allocation5 + $0x1], 0 }
   0x4   :  { %12 = vsyncpa [#allocation8], 0 }
   0x5   :  { %14 = vsyncpa [#allocation8 + $0x1], 0 }
   0x6   :  { %15 = vsyncpa [#allocation6], 0  ;;  %s963_s14 = smov 0   ;;  %s965_s15 = smov 0  }
   0x7   :  { %s967_s16 = smov 0   ;;  %s969_s17 = smov 0  }
   0x8   :  { %s971_s18 = smov 0   ;;  %s973_s19 = smov 0  }
   0x9 LB: > { %s644_s0 = sadd.s32 4294967295, %s930_s19   ;;  %s30_s20 = sadd.s32 1, %s926_s18  ;;  %s930_s19 = sphi %s973_s19, %s21_s19   ;;  %s926_s18 = sphi %s971_s18, %s1408_s18   ;;  %s922_s17 = sphi %s969_s17, %s1407_s17   ;;  %s918_s16 = sphi %s967_s16, %s1406_s16   ;;  %s914_s15 = sphi %s965_s15, %s1405_s15   ;;  %s910_s14 = sphi %s963_s14, %s1404_s14  }
   0xa   : > { %p31_p0 = scmp.ge.s32.totalorder %s30_s20, 2  ;;  %s44_s21 = sadd.s32 1, %s918_s16 }
   0xb   : > { %p51_p1 = scmp.ne.s32.totalorder %s918_s16, %s914_s15  ;;  %p52_p2 = scmp.eq.s32.totalorder %s930_s19, 0 }
   0xc   : > { %s1410_s20 = smov (%p31_p0, %s30_s20), 0  ;;  %p57_p4 = scmp.ne.s32.totalorder %s914_s15, %s910_s14 }
   0xd   : > { %p999_p3 = por %p52_p2, %p51_p1  ;;  %s41_s23 = ssub.s32 %s926_s18, %s1410_s20 }
   0xe   : > { %p58_p5 = scmp.eq.s32.totalorder %s644_s0, 0  ;;  %p42_p6 = scmp.eq.s32.totalorder %s41_s23, 0 }
   0xf   : > { %p646_p8 = scmp.ge.s32.totalorder %s930_s19, 2 }
  0x10   : > { %p1008_p7 = por %p58_p5, %p57_p4 }
  0x11   : > { %s1013_s25 = scalar_select %p42_p6, %s918_s16, %s44_s21  }
  0x12   : > { %133 = sbr.rel (%p646_p8) target bundleno = 95 (0x5f), region = 16 }
  0x17   : > { %136 = sbr.rel (!%p999_p3) target bundleno = 59 (0x3b), region = 20  ;;  %s137_s26 = sand.u32 (%p999_p3), 1, %s918_s16  }
  0x18   : > { %s648_s27 = sshll.u32 (%p999_p3), %s926_s18, 5  ;;  %s647_s28 = sshll.u32 (%p999_p3), %s137_s26, 8 }
  0x19   : > { %s145_s29 = ssub.s32 (%p999_p3), 38, %s648_s27  ;;  %s1023_s6 = scalar_lea.sflag (%p999_p3), [#allocation5], %s137_s26 }
  0x1a   : > { %p146_p9 = scmp.lt.s32.totalorder (%p999_p3), %s145_s29, 32  ;;  %s141_s7 = scalar_lea.vmem (%p999_p3), [#allocation4], %s647_s28 }
  0x1c   : > { %s1412_s29 = smov (!%p146_p9, %s145_s29), 32 }
  0x1d   : > { %s649_s30 = sshll.u32 %s1412_s29, 3 }
  0x1e   : > { %s149_s4 = ssub.s32 256, %s649_s30 }
  0x1f   : > { %s150_s5 = sshll.u32 %s149_s4, 4 }
  0x20   : > { %151 = vsyncadd %s1023_s6, %s150_s5  ;;  %p1026_p10 = scmp.ne.s32.totalorder %s649_s30, 0  ;;  %s702_s9 = sshll.u32 %s926_s18, 8 }
  0x21   : > { %s154_s12 = scalar_lea.hbm %s1397_s1, %s702_s9  ;;  %s1034_s13 = sshll.u32 %s141_s7, 4  ;;  %s159_s13 = int_to_ptr.vmem [resolvable:$true] %s1034_s13 }
  0x22   : > { %s156_s14 = sshll.u32 %s154_s12, 4  ;;  %s653_s21 = sshll.u32 %s1412_s29, 7  ;;  %s1037_s14 = int_to_ptr.hbm [resolvable:$true] %s156_s14 }
  0x23   : > { %s766_s23 = sshra.s32 %s1037_s14, 4  ;;  %s768_s26 = sshrl.u32 %s653_s21, 4  ;;  %s767_s23 = int_to_ptr.hbm [resolvable:$true] %s766_s23 }
  0x24   : > { %s773_s27 = scalar_lea.hbm %s767_s23, %s768_s26  ;;  %s777_s4 = scalar_lea.hbm %s1397_s1, 304 }
  0x25   : > { %p774_p11 = scmp.ne.s32.totalorder %s767_s23, %s773_s27  ;;  %p779_p0 = scmp.lt.s32.totalorder %s777_s4, %s773_s27 }
  0x27   : > { %p775_p12 = pnand %p774_p11, %p1026_p10 }
  0x29   : > { %p776_p13 = pneg %p775_p12 }
  0x2b   : > { %p781_p1 = pnand %p779_p0, %p776_p13 }
  0x2d   : > { %784 = shalt.err (!%p781_p1)
}
  0x2e   : > { %s785_s5 = sshra.s32 %s159_s13, 4  ;;  %s932_s9 = smov [#allocation4]   ;;  %s786_s5 = int_to_ptr.vmem [resolvable:$true] %s785_s5 }
  0x2f   : > { %s792_s7 = scalar_lea.vmem %s786_s5, %s768_s26  ;;  %s796_s10 = scalar_lea.vmem %s932_s9, 512 }
  0x30   : > { %p793_p2 = scmp.ne.s32.totalorder %s786_s5, %s792_s7  ;;  %p798_p6 = scmp.lt.s32.totalorder %s796_s10, %s792_s7 }
  0x32   : > { %p794_p4 = pnand %p793_p2, %p1026_p10 }
  0x34   : > { %p795_p5 = pneg %p794_p4 }
  0x36   : > { %p800_p8 = pnand %p798_p6, %p795_p5 }
  0x38   : > { %803 = shalt.err (!%p800_p8)
}
  0x39   : > { %s933_s11 = smov 128   ;;  %s934_s12 = smov 8  }
  0x3a   : > { %164 = dma.hbm_to_vmem [thread:$0]  (%p1026_p10), %s1037_s14, %s653_s21, %s159_s13, %s1023_s6, %s933_s11, %s933_s11, %s934_s12  }
  0x3b PF: > { %167 = sbr.rel (!%p999_p3) target bundleno = 95 (0x5f), region = 24  ;;  %s168_s23 = sand.u32 (%p999_p3), 1, %s918_s16  }
  0x3c   : > { %s655_s26 = sshll.u32 (%p999_p3), %s926_s18, 5  ;;  %s654_s27 = sshll.u32 (%p999_p3), %s168_s23, 8 }
  0x3d   : > { %s176_s28 = ssub.s32 (%p999_p3), 38, %s655_s26  ;;  %s1067_s5 = scalar_lea.sflag (%p999_p3), [#allocation8], %s168_s23 }
  0x3e   : > { %p177_p9 = scmp.lt.s32.totalorder (%p999_p3), %s176_s28, 32  ;;  %s172_s29 = scalar_lea.vmem (%p999_p3), [#allocation7], %s654_s27 }
  0x40   : > { %s1414_s28 = smov (!%p177_p9, %s176_s28), 32 }
  0x41   : > { %s656_s30 = sshll.u32 %s1414_s28, 3 }
  0x42   : > { %s180_s4 = ssub.s32 256, %s656_s30 }
  0x43   : > { %s181_s8 = sshll.u32 %s180_s4, 4 }
  0x44   : > { %182 = vsyncadd %s1067_s5, %s181_s8  ;;  %p1070_p3 = scmp.ne.s32.totalorder %s656_s30, 0  ;;  %s703_s6 = sshll.u32 %s926_s18, 8 }
  0x45   : > { %s185_s21 = scalar_lea.hbm %s1398_s2, %s703_s6  ;;  %s1078_s7 = sshll.u32 %s172_s29, 4  ;;  %s190_s7 = int_to_ptr.vmem [resolvable:$true] %s1078_s7 }
  0x46   : > { %s187_s9 = sshll.u32 %s185_s21, 4  ;;  %s660_s10 = sshll.u32 %s1414_s28, 7  ;;  %s1081_s9 = int_to_ptr.hbm [resolvable:$true] %s187_s9 }
  0x47   : > { %s805_s11 = sshra.s32 %s1081_s9, 4  ;;  %s807_s12 = sshrl.u32 %s660_s10, 4  ;;  %s806_s11 = int_to_ptr.hbm [resolvable:$true] %s805_s11 }
  0x48   : > { %s812_s23 = scalar_lea.hbm %s806_s11, %s807_s12  ;;  %s816_s30 = scalar_lea.hbm %s1398_s2, 304 }
  0x49   : > { %p813_p10 = scmp.ne.s32.totalorder %s806_s11, %s812_s23  ;;  %p818_p13 = scmp.lt.s32.totalorder %s816_s30, %s812_s23 }
  0x4b   : > { %p814_p11 = pnand %p813_p10, %p1070_p3 }
  0x4d   : > { %p815_p12 = pneg %p814_p11 }
  0x4f   : > { %p820_p0 = pnand %p818_p13, %p815_p12 }
  0x51   : > { %823 = shalt.err (!%p820_p0)
}
  0x52   : > { %s824_s4 = sshra.s32 %s190_s7, 4  ;;  %s935_s29 = smov [#allocation7]   ;;  %s825_s4 = int_to_ptr.vmem [resolvable:$true] %s824_s4 }
  0x53   : > { %s831_s8 = scalar_lea.vmem %s825_s4, %s807_s12  ;;  %s835_s6 = scalar_lea.vmem %s935_s29, 512 }
  0x54   : > { %p832_p1 = scmp.ne.s32.totalorder %s825_s4, %s831_s8  ;;  %p837_p5 = scmp.lt.s32.totalorder %s835_s6, %s831_s8 }
  0x56   : > { %p833_p2 = pnand %p832_p1, %p1070_p3 }
  0x58   : > { %p834_p4 = pneg %p833_p2 }
  0x5a   : > { %p839_p6 = pnand %p837_p5, %p834_p4 }
  0x5c   : > { %842 = shalt.err (!%p839_p6)
}
  0x5d   : > { %s936_s13 = smov 128   ;;  %s937_s14 = smov 8  }
  0x5e   : > { %195 = dma.hbm_to_vmem [thread:$0]  (%p1070_p3), %s1081_s9, %s660_s10, %s190_s7, %s1067_s5, %s936_s13, %s936_s13, %s937_s14  }
  0x5f PF: > { %p661_p8 = scmp.ge.s32.totalorder %s930_s19, 1  ;;  %p197_p9 = scmp.lt.s32.totalorder %s930_s19, 3 }
  0x61   : > { %p198_p10 = pnand %p661_p8, %p197_p9 }
  0x62   : > { %s203_s21 = sand.u32 (!%p198_p10), 1, %s914_s15  }
  0x63   : > { %201 = sbr.rel (%p198_p10) target bundleno = 186 (0xba), region = 28  ;;  %s662_s11 = sshll.u32 (!%p198_p10), %s203_s21, 8 }
  0x64   : > { %s204_s12 = scalar_lea.sflag (!%p198_p10), [#allocation5], %s203_s21  ;;  %s1107_s23 = scalar_lea.vmem (!%p198_p10), [#allocation4], %s662_s11 }
  0x68   : > { %897 = dma.done.wait (%p1008_p7), %s204_s12, 4096  }
  0x69   : > { %899 = vsyncadd (%p1008_p7), %s204_s12, 4294963200  ;;  %s214_s28 = scalar_lea.sflag [#allocation8], %s203_s21  ;;  %s1113_s5 = scalar_lea.vmem [#allocation7], %s662_s11 }
  0x6a   : > { %901 = dma.done.wait (%p1008_p7), %s214_s28, 4096  }
  0x6b   : > { %903 = vsyncadd (%p1008_p7), %s214_s28, 4294963200  ;;  %p664_p3 = scmp.ne.s32.totalorder %s922_s17, 0 }
  0x6d   : > { %256 = sbr.rel (%p664_p3) target bundleno = 116 (0x74), region = 40 }
  0x72   : > { %v938_v0 = vmov 0.0  }
  0x73   : > { %257 = vst [vmem:[#allocation9] sm:$0xff] %v938_v0 }
  0x74 PF: > { %v327_v1 = vlaneseq  ;;  %s258_s24 = sld [smem:[#allocation3]]  ;;  %s665_s22 = sshll.u32 %s922_s17, 8  ;;  %v262_v3 = vld [vmem:[%s1107_s23] sm:$0xff]  ;;  %v263_v4 = vld [vmem:[%s1107_s23 + $0x8] sm:$0xff]  ;;  %v264_v9 = vld [vmem:[%s1107_s23 + $0x10] sm:$0xff] }
  0x75   : > { %v278_v5 = vld [vmem:[%s1113_s5] sm:$0xff]  ;;  %v279_v6 = vld [vmem:[%s1113_s5 + $0x8] sm:$0xff]  ;;  %v1132_v8 = vstv %s665_s22  ;;  %v280_v10 = vld [vmem:[%s1113_s5 + $0x10] sm:$0xff]  ;;  %s476_s7 = sadd.s32 128, %s665_s22  ;;  %s939_s17 = smov [#allocation9]  }
  0x76   : > { %v1120_v2 = vshrl.u32 %v327_v1, 7  ;;  %v294_v12 = vsub.f32 %v262_v3, %v278_v5  ;;  %v295_v13 = vsub.f32 %v263_v4, %v279_v6  ;;  %v265_v14 = vld [vmem:[%s1107_s23 + $0x18] sm:$0xff]  ;;  %v296_v19 = vsub.f32 %v264_v9, %v280_v10  ;;  %v266_v21 = vld [vmem:[%s1107_s23 + $0x20] sm:$0xff]  ;;  %v267_v28 = vld [vmem:[%s1107_s23 + $0x28] sm:$0xff]  ;;  %s553_s9 = sshll.u32 %s939_s17, 4  ;;  %s555_s27 = sshll.u32 %s1399_s3, 4  ;;  %s554_s9 = int_to_ptr.vmem [resolvable:$true] %s553_s9  ;;  %s556_s27 = int_to_ptr.hbm [resolvable:$true] %s555_s27 }
  0x77   : > { %v281_v15 = vld [vmem:[%s1113_s5 + $0x18] sm:$0xff]  ;;  %v282_v22 = vld [vmem:[%s1113_s5 + $0x20] sm:$0xff]  ;;  %v283_v29 = vld [vmem:[%s1113_s5 + $0x28] sm:$0xff]  ;;  %v1200_v0 = vstv %s476_s7  ;;  %p710_p7 = scmp.eq.s32.totalorder %s644_s0, 1 }
  0x78   : > { %v1128_v7 = vadd.s32 8, %v1120_v2  ;;  %v1137_v11 = vadd.s32 16, %v1120_v2  ;;  %v1142_v16 = vadd.s32 24, %v1120_v2  ;;  %v345_v17 = vadd.s32 %v1132_v8, %v1120_v2  ;;  %v268_v36 = vld [vmem:[%s1107_s23 + $0x30] sm:$0xff]  ;;  %v269_v43 = vld [vmem:[%s1107_s23 + $0x38] sm:$0xff]  ;;  %v270_v44 = vld [vmem:[%s1107_s23 + $0x40] sm:$0xff] }
  0x79   : > { %v1153_v23 = vadd.s32 32, %v1120_v2  ;;  %v297_v25 = vsub.f32 %v265_v14, %v281_v15  ;;  %v310_v26 = vmul.f32 %v294_v12, %v294_v12  ;;  %v311_v27 = vmul.f32 %v295_v13, %v295_v13  ;;  %v284_v37 = vld [vmem:[%s1113_s5 + $0x30] sm:$0xff]  ;;  %v271_v45 = vld [vmem:[%s1107_s23 + $0x48] sm:$0xff]  ;;  %v285_v49 = vld [vmem:[%s1113_s5 + $0x38] sm:$0xff] }
  0x7a   : > { %v346_v18 = vadd.s32 %v1132_v8, %v1128_v7  ;;  %v1148_v20 = vstv %s258_s24  ;;  %v347_v24 = vadd.s32 %v1132_v8, %v1137_v11  ;;  %v1160_v30 = vadd.s32 40, %v1120_v2  ;;  %v272_v48 = vld [vmem:[%s1107_s23 + $0x50] sm:$0xff]  ;;  %v286_v50 = vld [vmem:[%s1113_s5 + $0x40] sm:$0xff]  ;;  %v273_v53 = vld [vmem:[%s1107_s23 + $0x58] sm:$0xff] }
  0x7b   : > { %v348_v31 = vadd.s32 %v1132_v8, %v1142_v16  ;;  %vm362_vm0 = vcmp.lt.s32.totalorder %v345_v17, %v1148_v20  ;;  %v298_v32 = vsub.f32 %v266_v21, %v282_v22  ;;  %v312_v33 = vmul.f32 %v296_v19, %v296_v19  ;;  %v287_v54 = vld [vmem:[%s1113_s5 + $0x48] sm:$0xff]  ;;  %v288_v55 = vld [vmem:[%s1113_s5 + $0x50] sm:$0xff]  ;;  %v274_v60 = vld [vmem:[%s1107_s23 + $0x60] sm:$0xff] }
  0x7c   : > { %vm363_vm1 = vcmp.lt.s32.totalorder %v346_v18, %v1148_v20  ;;  %v1167_v34 = vadd.s32 48, %v1120_v2  ;;  %v349_v35 = vadd.s32 %v1132_v8, %v1153_v23  ;;  %vm364_vm2 = vcmp.lt.s32.totalorder %v347_v24, %v1148_v20  ;;  %v275_v61 = vld [vmem:[%s1107_s23 + $0x68] sm:$0xff]  ;;  %v289_v62 = vld [vmem:[%s1113_s5 + $0x58] sm:$0xff]  ;;  %v276_v1 = vld [vmem:[%s1107_s23 + $0x70] sm:$0xff] }
  0x7d   : > { %v299_v38 = vsub.f32 %v267_v28, %v283_v29  ;;  %v313_v39 = vmul.f32 %v297_v25, %v297_v25  ;;  %v378_v40 = vsel %vm362_vm0, %v310_v26, 0.0  ;;  %v379_v41 = vsel %vm363_vm1, %v311_v27, 0.0  ;;  %v290_v3 = vld [vmem:[%s1113_s5 + $0x60] sm:$0xff]  ;;  %v291_v4 = vld [vmem:[%s1113_s5 + $0x68] sm:$0xff]  ;;  %v277_v12 = vld [vmem:[%s1107_s23 + $0x78] sm:$0xff] }
  0x7e   : > { %v350_v42 = vadd.s32 %v1132_v8, %v1160_v30  ;;  %vm365_vm3 = vcmp.lt.s32.totalorder %v348_v31, %v1148_v20  ;;  %v314_v46 = vmul.f32 %v298_v32, %v298_v32  ;;  %v380_v47 = vsel %vm364_vm2, %v312_v33, 0.0  ;;  %v292_v13 = vld [vmem:[%s1113_s5 + $0x70] sm:$0xff]  ;;  %v293_v14 = vld [vmem:[%s1113_s5 + $0x78] sm:$0xff]  ;;  %v666_v28 = vld [vmem:[%s1107_s23 + $0x80] sm:$0xff] }
  0x7f   : > { %v300_v51 = vsub.f32 %v268_v36, %v284_v37  ;;  %vm366_vm4 = vcmp.lt.s32.totalorder %v349_v35, %v1148_v20  ;;  %v394_v52 = vadd.f32 %v379_v41, %v378_v40  ;;  %v315_v56 = vmul.f32 %v299_v38, %v299_v38  ;;  %v667_v36 = vld [vmem:[%s1107_s23 + $0x88] sm:$0xff]  ;;  %v682_v37 = vld [vmem:[%s1113_s5 + $0x80] sm:$0xff] }
  0x80   : > { %v1190_v57 = vadd.s32 56, %v1120_v2  ;;  %v351_v58 = vadd.s32 %v1132_v8, %v1167_v34  ;;  %v381_v59 = vsel %vm365_vm3, %v313_v39, 0.0  ;;  %vm367_vm5 = vcmp.lt.s32.totalorder %v350_v42, %v1148_v20  ;;  %v683_v38 = vld [vmem:[%s1113_s5 + $0x88] sm:$0xff] }
  0x81   : > { %v395_v63 = vadd.f32 %v394_v52, %v380_v47  ;;  %v301_v5 = vsub.f32 %v269_v43, %v285_v49  ;;  %v302_v6 = vsub.f32 %v270_v44, %v286_v50  ;;  %v1206_v9 = vadd.s32 64, %v1120_v2  ;;  %v684_v47 = vld [vmem:[%s1113_s5 + $0x90] sm:$0xff] }
  0x82   : > { %v382_v10 = vsel %vm366_vm4, %v314_v46, 0.0  ;;  %v303_v15 = vsub.f32 %v271_v45, %v287_v54  ;;  %v304_v17 = vsub.f32 %v272_v48, %v288_v55  ;;  %v316_v18 = vmul.f32 %v300_v51, %v300_v51  ;;  %v668_v46 = vld [vmem:[%s1107_s23 + $0x90] sm:$0xff]  ;;  %v669_v55 = vld [vmem:[%s1107_s23 + $0x98] sm:$0xff] }
  0x83   : > { %v396_v19 = vadd.f32 %v395_v63, %v381_v59  ;;  %v305_v21 = vsub.f32 %v273_v53, %v289_v62  ;;  %v352_v22 = vadd.s32 %v1132_v8, %v1190_v57  ;;  %vm368_vm6 = vcmp.lt.s32.totalorder %v351_v58, %v1148_v20 }
  0x84   : > { %v383_v24 = vsel %vm367_vm5, %v315_v56, 0.0  ;;  %v306_v25 = vsub.f32 %v274_v60, %v290_v3  ;;  %v307_v26 = vsub.f32 %v275_v61, %v291_v4  ;;  %v478_v29 = vadd.s32 %v1200_v0, %v1120_v2  ;;  %v685_v56 = vld [vmem:[%s1113_s5 + $0x98] sm:$0xff]  ;;  %v670_v3 = vld [vmem:[%s1107_s23 + $0xa0] sm:$0xff] }
  0x85   : > { %v397_v27 = vadd.f32 %v396_v19, %v382_v10  ;;  %v308_v31 = vsub.f32 %v276_v1, %v292_v13  ;;  %v1221_v32 = vsub.f32 %v277_v12, %v293_v14  ;;  %v317_v33 = vmul.f32 %v301_v5, %v301_v5  ;;  %v671_v14 = vld [vmem:[%s1107_s23 + $0xa8] sm:$0xff] }
  0x86   : > { %v1224_v35 = vadd.s32 72, %v1120_v2  ;;  %v318_v39 = vmul.f32 %v302_v6, %v302_v6  ;;  %v319_v40 = vmul.f32 %v303_v15, %v303_v15  ;;  %v384_v41 = vsel %vm368_vm6, %v316_v18, 0.0  ;;  %v687_v15 = vld [vmem:[%s1113_s5 + $0xa8] sm:$0xff] }
  0x87   : > { %v398_v42 = vadd.f32 %v397_v27, %v383_v24  ;;  %v1231_v43 = vmul.f32 %v304_v17, %v304_v17  ;;  %v1233_v44 = vmul.f32 %v305_v21, %v305_v21  ;;  %v353_v45 = vadd.s32 %v1132_v8, %v1206_v9  ;;  %v672_v24 = vld [vmem:[%s1107_s23 + $0xb0] sm:$0xff] }
  0x88   : > { %vm369_vm7 = vcmp.lt.s32.totalorder %v352_v22, %v1148_v20  ;;  %v1240_v48 = vmul.f32 %v306_v25, %v306_v25  ;;  %v1242_v49 = vmul.f32 %v307_v26, %v307_v26  ;;  %v444_v50 = vsub.f32 %v666_v28, %v682_v37  ;;  %v688_v25 = vld [vmem:[%s1113_s5 + $0xb0] sm:$0xff] }
  0x89   : > { %v445_v51 = vsub.f32 %v667_v36, %v683_v38  ;;  %v1244_v52 = vmul.f32 %v308_v31, %v308_v31  ;;  %v1247_v53 = vadd.s32 80, %v1120_v2  ;;  %v399_v54 = vadd.f32 %v398_v42, %v384_v41  ;;  %v689_v36 = vld [vmem:[%s1113_s5 + $0xb8] sm:$0xff]  ;;  %v674_v42 = vld [vmem:[%s1107_s23 + $0xc0] sm:$0xff] }
  0x8a   : > { %v479_v58 = vadd.s32 %v1200_v0, %v1128_v7  ;;  %v1254_v59 = vadd.s32 88, %v1120_v2  ;;  %v1257_v60 = vadd.s32 96, %v1120_v2  ;;  %v385_v61 = vsel %vm369_vm7, %v317_v33, 0.0  ;;  %v686_v7 = vld [vmem:[%s1113_s5 + $0xa0] sm:$0xff]  ;;  %v673_v33 = vld [vmem:[%s1107_s23 + $0xb8] sm:$0xff] }
  0x8b   : > { %v446_v62 = vsub.f32 %v668_v46, %v684_v47  ;;  %v1260_v63 = vadd.s32 104, %v1120_v2  ;;  %v354_v1 = vadd.s32 %v1132_v8, %v1224_v35  ;;  %vm370_vm8 = vcmp.lt.s32.totalorder %v353_v45, %v1148_v20  ;;  %v690_v45 = vld [vmem:[%s1113_s5 + $0xc0] sm:$0xff] }
  0x8c   : > { %v480_v4 = vadd.s32 %v1200_v0, %v1137_v11  ;;  %v1270_v5 = vadd.s32 112, %v1120_v2  ;;  %v447_v6 = vsub.f32 %v669_v55, %v685_v56  ;;  %v460_v10 = vmul.f32 %v444_v50, %v444_v50  ;;  %v675_v55 = vld [vmem:[%s1107_s23 + $0xc8] sm:$0xff] }
  0x8d   : > { %v461_v12 = vmul.f32 %v445_v51, %v445_v51  ;;  %v400_v13 = vadd.f32 %v399_v54, %v385_v61  ;;  %v481_v17 = vadd.s32 %v1200_v0, %v1142_v16  ;;  %vm494_vm9 = vcmp.lt.s32.totalorder %v478_v29, %v1148_v20  ;;  %v691_v56 = vld [vmem:[%s1113_s5 + $0xc8] sm:$0xff] }
  0x8e   : > { %vm495_vm10 = vcmp.lt.s32.totalorder %v479_v58, %v1148_v20  ;;  %v1279_v11 = vadd.s32 120, %v1120_v2  ;;  %v386_v18 = vsel %vm370_vm8, %v318_v39, 0.0  ;;  %v448_v19 = vsub.f32 %v670_v3, %v686_v7  ;;  %v676_v7 = vld [vmem:[%s1107_s23 + $0xd0] sm:$0xff] }
  0x8f   : > { %v462_v21 = vmul.f32 %v446_v62, %v446_v62  ;;  %v355_v22 = vadd.s32 %v1132_v8, %v1247_v53  ;;  %vm371_vm11 = vcmp.lt.s32.totalorder %v354_v1, %v1148_v20  ;;  %v482_v16 = vadd.s32 %v1200_v0, %v1153_v23 }
  0x90   : > { %vm496_vm12 = vcmp.lt.s32.totalorder %v480_v4, %v1148_v20  ;;  %v449_v2 = vsub.f32 %v671_v14, %v687_v15  ;;  %v463_v26 = vmul.f32 %v447_v6, %v447_v6  ;;  %v510_v27 = vsel %vm494_vm9, %v460_v10, 0.0  ;;  %v692_v4 = vld [vmem:[%s1113_s5 + $0xd0] sm:$0xff]  ;;  %v677_v15 = vld [vmem:[%s1107_s23 + $0xd8] sm:$0xff] }
  0x91   : > { %v511_v28 = vsel %vm495_vm10, %v461_v12, 0.0  ;;  %v356_v29 = vadd.s32 %v1132_v8, %v1254_v59  ;;  %v401_v31 = vadd.f32 %v400_v13, %v386_v18  ;;  %v483_v37 = vadd.s32 %v1200_v0, %v1160_v30 }
  0x92   : > { %vm497_vm13 = vcmp.lt.s32.totalorder %v481_v17, %v1148_v20  ;;  %v387_v23 = vsel %vm371_vm11, %v319_v40, 0.0  ;;  %v450_v38 = vsub.f32 %v672_v24, %v688_v25  ;;  %v464_v39 = vmul.f32 %v448_v19, %v448_v19  ;;  %v693_v17 = vld [vmem:[%s1113_s5 + $0xd8] sm:$0xff]  ;;  %v678_v25 = vld [vmem:[%s1107_s23 + $0xe0] sm:$0xff] }
  0x93   : > { %v512_v41 = vsel %vm496_vm12, %v462_v21, 0.0  ;;  %vm372_vm14 = vcmp.lt.s32.totalorder %v355_v22, %v1148_v20  ;;  %v484_v46 = vadd.s32 %v1200_v0, %v1167_v34  ;;  %vm498_vm15 = vcmp.lt.s32.totalorder %v482_v16, %v1148_v20  ;;  %v694_v16 = vld [vmem:[%s1113_s5 + $0xe0] sm:$0xff] }
  0x94   : > { %v526_v47 = vadd.f32 %v511_v28, %v510_v27  ;;  %v357_v30 = vadd.s32 %v1132_v8, %v1257_v60  ;;  %v451_v40 = vsub.f32 %v673_v33, %v689_v36  ;;  %v465_v50 = vmul.f32 %v449_v2, %v449_v2  ;;  %v695_v33 = vld [vmem:[%s1113_s5 + $0xe8] sm:$0xff] }
  0x95   : > { %v513_v51 = vsel %vm497_vm13, %v463_v26, 0.0  ;;  %v402_v54 = vadd.f32 %v401_v31, %v387_v23  ;;  %v485_v58 = vadd.s32 %v1200_v0, %v1190_v57  ;;  %vm499_vm0 = vcmp.lt.s32.totalorder %v483_v37, %v1148_v20  ;;  %v679_v31 = vld [vmem:[%s1107_s23 + $0xe8] sm:$0xff] }
  0x96   : > { %v527_v34 = vadd.f32 %v526_v47, %v512_v41  ;;  %v388_v61 = vsel %vm372_vm14, %v1231_v43, 0.0  ;;  %v452_v62 = vsub.f32 %v674_v42, %v690_v45  ;;  %v466_v1 = vmul.f32 %v450_v38, %v450_v38  ;;  %v680_v41 = vld [vmem:[%s1107_s23 + $0xf0] sm:$0xff] }
  0x97   : > { %v514_v3 = vsel %vm498_vm15, %v464_v39, 0.0  ;;  %vm373_vm1 = vcmp.lt.s32.totalorder %v356_v29, %v1148_v20  ;;  %v486_v6 = vadd.s32 %v1200_v0, %v1206_v9  ;;  %vm500_vm2 = vcmp.lt.s32.totalorder %v484_v46, %v1148_v20  ;;  %v696_v42 = vld [vmem:[%s1113_s5 + $0xf0] sm:$0xff] }
  0x98   : > { %v528_v57 = vadd.f32 %v527_v34, %v513_v51  ;;  %v358_v10 = vadd.s32 %v1132_v8, %v1260_v63  ;;  %v453_v43 = vsub.f32 %v675_v55, %v691_v56  ;;  %v467_v12 = vmul.f32 %v451_v40, %v451_v40  ;;  %v697_v51 = vld [vmem:[%s1113_s5 + $0xf8] sm:$0xff] }
  0x99   : > { %v515_v13 = vsel %vm499_vm0, %v465_v50, 0.0  ;;  %v403_v14 = vadd.f32 %v402_v54, %v388_v61  ;;  %v487_v18 = vadd.s32 %v1200_v0, %v1224_v35  ;;  %vm501_vm3 = vcmp.lt.s32.totalorder %v485_v58, %v1148_v20  ;;  %v681_v50 = vld [vmem:[%s1107_s23 + $0xf8] sm:$0xff] }
  0x9a   : > { %v529_v9 = vadd.f32 %v528_v57, %v514_v3  ;;  %v389_v19 = vsel %vm373_vm1, %v1233_v44, 0.0  ;;  %v454_v21 = vsub.f32 %v676_v7, %v692_v4  ;;  %v468_v22 = vmul.f32 %v452_v62, %v452_v62 }
  0x9b   : > { %v516_v24 = vsel %vm500_vm2, %v466_v1, 0.0  ;;  %vm374_vm4 = vcmp.lt.s32.totalorder %v357_v30, %v1148_v20  ;;  %v488_v2 = vadd.s32 %v1200_v0, %v1247_v53  ;;  %vm502_vm5 = vcmp.lt.s32.totalorder %v486_v6, %v1148_v20 }
  0x9c   : > { %v530_v35 = vadd.f32 %v529_v9, %v515_v13  ;;  %v359_v26 = vadd.s32 %v1132_v8, %v1270_v5  ;;  %v455_v44 = vsub.f32 %v677_v15, %v693_v17  ;;  %v469_v27 = vmul.f32 %v453_v43, %v453_v43  ;;  %v542_v9 = vld [vmem:[#allocation9] sm:$0xff] }
  0x9d   : > { %v517_v28 = vsel %vm501_vm3, %v467_v12, 0.0  ;;  %v404_v29 = vadd.f32 %v403_v14, %v389_v19  ;;  %v489_v36 = vadd.s32 %v1200_v0, %v1254_v59  ;;  %vm503_vm6 = vcmp.lt.s32.totalorder %v487_v18, %v1148_v20 }
  0x9e   : > { %v531_v53 = vadd.f32 %v530_v35, %v516_v24  ;;  %v390_v37 = vsel %vm374_vm4, %v1240_v48, 0.0  ;;  %v456_v23 = vsub.f32 %v678_v25, %v694_v16  ;;  %v470_v38 = vmul.f32 %v454_v21, %v454_v21 }
  0x9f   : > { %v518_v39 = vsel %vm502_vm5, %v468_v22, 0.0  ;;  %vm375_vm7 = vcmp.lt.s32.totalorder %v358_v10, %v1148_v20  ;;  %v490_v45 = vadd.s32 %v1200_v0, %v1257_v60  ;;  %vm504_vm8 = vcmp.lt.s32.totalorder %v488_v2, %v1148_v20 }
  0xa0   : > { %v532_v59 = vadd.f32 %v531_v53, %v517_v28  ;;  %v360_v46 = vadd.s32 %v1132_v8, %v1279_v11  ;;  %v457_v47 = vsub.f32 %v679_v31, %v695_v33  ;;  %v471_v30 = vmul.f32 %v455_v44, %v455_v44 }
  0xa1   : > { %v519_v48 = vsel %vm503_vm6, %v469_v27, 0.0  ;;  %v405_v40 = vadd.f32 %v404_v29, %v390_v37  ;;  %v491_v54 = vadd.s32 %v1200_v0, %v1260_v63  ;;  %vm505_vm9 = vcmp.lt.s32.totalorder %v489_v36, %v1148_v20 }
  0xa2   : > { %v533_v55 = vadd.f32 %v532_v59, %v518_v39  ;;  %v391_v60 = vsel %vm375_vm7, %v1242_v49, 0.0  ;;  %v458_v56 = vsub.f32 %v680_v41, %v696_v42  ;;  %v472_v58 = vmul.f32 %v456_v23, %v456_v23 }
  0xa3   : > { %v520_v34 = vsel %vm504_vm8, %v470_v38, 0.0  ;;  %vm376_vm10 = vcmp.lt.s32.totalorder %v359_v26, %v1148_v20  ;;  %v492_v8 = vadd.s32 %v1200_v0, %v1270_v5  ;;  %vm506_vm11 = vcmp.lt.s32.totalorder %v490_v45, %v1148_v20 }
  0xa4   : > { %v534_v61 = vadd.f32 %v533_v55, %v519_v48  ;;  %v459_v62 = vsub.f32 %v681_v50, %v697_v51  ;;  %v473_v63 = vmul.f32 %v457_v47, %v457_v47  ;;  %v521_v1 = vsel %vm505_vm9, %v471_v30, 0.0 }
  0xa5   : > { %v406_v3 = vadd.f32 %v405_v40, %v391_v60  ;;  %v493_v7 = vadd.s32 %v1200_v0, %v1279_v11  ;;  %vm507_vm12 = vcmp.lt.s32.totalorder %v491_v54, %v1148_v20  ;;  %v325_v4 = vmul.f32 %v1221_v32, %v1221_v32 }
  0xa6   : > { %v535_v49 = vadd.f32 %v534_v61, %v520_v34  ;;  %v392_v6 = vsel %vm376_vm10, %v1244_v52, 0.0  ;;  %v474_v57 = vmul.f32 %v458_v56, %v458_v56  ;;  %v522_v5 = vsel %vm506_vm11, %v472_v58, 0.0 }
  0xa7   : > { %vm377_vm13 = vcmp.lt.s32.totalorder %v360_v46, %v1148_v20  ;;  %vm508_vm14 = vcmp.lt.s32.totalorder %v492_v8, %v1148_v20  ;;  %v475_v43 = vmul.f32 %v459_v62, %v459_v62  ;;  %v523_v12 = vsel %vm507_vm12, %v473_v63, 0.0 }
  0xa8   : > { %v536_v10 = vadd.f32 %v535_v49, %v521_v1  ;;  %v407_v13 = vadd.f32 %v406_v3, %v392_v6  ;;  %vm509_vm15 = vcmp.lt.s32.totalorder %v493_v7, %v1148_v20  ;;  %v393_v11 = vsel %vm377_vm13, %v325_v4, 0.0 }
  0xa9   : > { %v524_v14 = vsel %vm508_vm14, %v474_v57, 0.0  ;;  %v525_v32 = vsel %vm509_vm15, %v475_v43, 0.0 }
  0xaa   : > { %v537_v0 = vadd.f32 %v536_v10, %v522_v5  ;;  %v408_v17 = vadd.f32 %v407_v13, %v393_v11 }
  0xac   : > { %v538_v15 = vadd.f32 %v537_v0, %v523_v12 }
  0xae   : > { %v539_v52 = vadd.f32 %v538_v15, %v524_v14 }
  0xb0   : > { %v540_v18 = vadd.f32 %v539_v52, %v525_v32 }
  0xb2   : > { %v541_v19 = vadd.f32 %v540_v18, %v408_v17 }
  0xb4   : > { %v543_v21 = vadd.f32 %v542_v9, %v541_v19 }
  0xb6   : > { %544 = vst [vmem:[#allocation9] sm:$0xff] %v543_v21 }
  0xb7   : > { %707 = dma.vmem_to_hbm [thread:$0]  (%p710_p7), %s554_s9, 128, %s556_s27, [#allocation6]  }
  0xb8   : > { %905 = dma.done.wait (%p710_p7), [#allocation6], 128  }
  0xb9   : > { %907 = vsyncadd (%p710_p7), [#allocation6], 4294967168 }
  0xba PF: > { %s21_s19 = sadd.s32 1, %s930_s19   ;;  %s1404_s14 = smov %s914_s15 }
  0xbb   : > { %p18_p11 = scmp.ge.s32.totalorder %s21_s19, 4   ;;  %s1405_s15 = smov %s918_s16 }
  0xbc   : > { %s1406_s16 = smov %s1013_s25  ;;  %s1407_s17 = smov %s926_s18 }
  0xbd   : > { %s1408_s18 = smov %s1410_s20  ;;  %20 = sbr.rel (!%p18_p11) target bundleno = 9 (0x9), region = 85 }
  0xc2   :  { %569 = vsyncpa [#allocation5], 1 }
  0xc3   :  { %571 = vsyncpa [#allocation5 + $0x1], 1 }
  0xc4   :  { %572 = vsyncpa [#allocation8], 1 }
  0xc5   :  { %574 = vsyncpa [#allocation8 + $0x1], 1 }
  0xc6   :  { %575 = vsyncpa [#allocation6], 1 }
  0xc7   :  { %577 = vsyncpa [#allocation6 + $0x1], 1 }

</bundles_post_ra>
